<compile_context>
chip_gen: v7x
topology: tpu7x:2x2x1
jax: 0.10.0
libtpu: 0.0.40
codegen_flags: <defaults>
</compile_context>

<pallas_src>
import functools

import numpy as np
import jax
import jax.numpy as jnp
from jax.experimental import pallas as pl
from jax.experimental.pallas import tpu as pltpu


LANE_ALIGN = 256  # 256-granule N fills v6e/v7x MXU columns; also a multiple of 128 for v5e.


def _round_up(n, m):
    return ((n + m - 1) // m) * m


def _cdiv(a, b):
    return -(-a // b)


# ----------------------------- MADE mask construction (glue) -----------------------------

def create_degrees(n_inputs, n_hiddens, input_order="sequential", mode="sequential"):
    assert input_order == "sequential" and mode == "sequential"
    degrees = [np.arange(1, n_inputs + 1)]
    for n in n_hiddens:
        degrees_l = np.arange(n) % max(1, n_inputs - 1) + min(1, n_inputs - 1)
        degrees.append(degrees_l)
    return degrees


def create_masks(degrees):
    Ms = []
    for d0, d1 in zip(degrees[:-1], degrees[1:]):
        Ms.append((d0[:, np.newaxis] <= d1).astype(np.float32))
    Mmp = (degrees[-1][:, np.newaxis] < degrees[0]).astype(np.float32)
    return Ms, Mmp


def create_params(key, n_conditionals, n_inputs, n_hiddens):
    """Deterministic synthetic init of the MADE weights (shapes as in goldmine)."""
    ks = jax.random.split(key, 2 * (len(n_hiddens) + 3))
    k = iter(ks)

    def init(shape, scale):
        return (scale * jax.random.normal(next(k), shape)).astype(jnp.float32)

    H0 = n_hiddens[0]
    Wx = init((n_conditionals, H0), 1.0 / np.sqrt(n_conditionals + 1))
    Ws, bs = [], []
    prev = n_inputs
    for h in n_hiddens:
        Ws.append(init((prev, h), 1.0 / np.sqrt(prev + 1)))
        bs.append(init((1, h), 0.01))
        prev = h
    Wm = init((prev, n_inputs), 1.0 / np.sqrt(prev + 1))
    bm = init((1, n_inputs), 0.01)
    Wp = init((prev, n_inputs), 1.0 / np.sqrt(prev + 1))
    bp = init((1, n_inputs), 0.01)
    return Wx, Ws, bs, Wm, bm, Wp, bp


# ----------------------------- Pallas kernel -----------------------------

def _made_kernel(n_inputs, n_layers, mxu_dtype):
    log2pi_const = float(n_inputs * np.log(2.0 * np.pi))

    def kernel(*refs):
        # refs: x_fm, theta_fm, W0x, W0t, b0, (Wl, bl)*(n_layers-1), Wh, bh, u_out, ll_out
        x_ref, th_ref = refs[0], refs[1]
        w0x_ref, w0t_ref, b0_ref = refs[2], refs[3], refs[4]
        layer_refs = refs[5:5 + 2 * (n_layers - 1)]
        wh_ref = refs[5 + 2 * (n_layers - 1)]
        bh_ref = refs[6 + 2 * (n_layers - 1)]
        u_ref, ll_ref = refs[-2], refs[-1]

        x = x_ref[...]                                     # (n_inputs, bt), f32

        # First hidden layer, split into two dots (K = n_inputs and K = n_cond),
        # summed before the ReLU — avoids any wrapper-side [x | theta] concat.
        h = (jnp.dot(w0x_ref[...].astype(mxu_dtype), x.astype(mxu_dtype),
                     preferred_element_type=jnp.float32)
             + jnp.dot(w0t_ref[...].astype(mxu_dtype), th_ref[...].astype(mxu_dtype),
                       preferred_element_type=jnp.float32)
             + b0_ref[...])
        h = jnp.maximum(h, 0.0)

        # Remaining hidden layers.
        for l in range(n_layers - 1):
            wl = layer_refs[2 * l][...]
            bl = layer_refs[2 * l + 1][...]
            h = jnp.maximum(
                jnp.dot(wl.astype(mxu_dtype), h.astype(mxu_dtype),
                        preferred_element_type=jnp.float32) + bl, 0.0)

        # Fused output heads: [Mmp*Wm ; Mmp*Wp] @ h + [bm ; bp] -> (2*n_inputs, bt).
        mp = (jnp.dot(wh_ref[...].astype(mxu_dtype), h.astype(mxu_dtype),
                      preferred_element_type=jnp.float32) + bh_ref[...])
        m = mp[:n_inputs, :]
        logp = mp[n_inputs:, :]

        u = jnp.exp(0.5 * logp) * (x - m)                  # full-lane VPU/EUP work
        u_ref[...] = u.astype(u_ref.dtype)                 # lane-dense, unmasked store

        # ll = -0.5 * (n*log(2pi) + sum(u^2 - logp)) : sublane reduction over n_inputs rows.
        diff = jnp.sum(u * u - logp, axis=0, keepdims=True)   # (1, bt)
        ll_ref[...] = (-0.5 * (log2pi_const + diff)).astype(ll_ref.dtype)

    return kernel


# ----------------------------- Wrapper -----------------------------

def prepare_feature_major_params(masked_params):
    """Static, layout-only transformation of the masked weights for the kernel."""
    Wx, Ws_masked, bs, Wm_masked, bm, Wp_masked, bp = masked_params
    W0x_fm = Ws_masked[0].T                                    # (H0, n_inputs)
    W0t_fm = Wx.T                                              # (H0, n_cond)
    b0_fm = bs[0].T                                            # (H0, 1)
    layers_fm = []
    for W, b in zip(Ws_masked[1:], bs[1:]):
        layers_fm += [W.T, b.T]                                # (Hl, Hl-1), (Hl, 1)
    Wh_fm = jnp.concatenate([Wm_masked, Wp_masked], axis=1).T  # (2*n_inputs, H_last)
    bh_fm = jnp.concatenate([bm, bp], axis=1).T                # (2*n_inputs, 1)
    return (W0x_fm, W0t_fm, b0_fm, tuple(layers_fm), Wh_fm, bh_fm)


def _choose_batch_tile(B, batch_tile):
    """Lane-dense (>=256), adaptive batch tile; >=2 (even) grid steps for large B."""
    bt_cap = max(LANE_ALIGN, _round_up(batch_tile, LANE_ALIGN))
    n_steps = _cdiv(B, bt_cap)
    if B >= 4 * LANE_ALIGN:            # "large" batch: always give v7x's 2 TCs work
        n_steps = max(n_steps, 2)
    if n_steps > 1 and n_steps % 2 == 1:
        n_steps += 1                   # even step count balances the 2 TCs; free on 1-TC chips
    bt = max(LANE_ALIGN, _round_up(_cdiv(B, n_steps), LANE_ALIGN))
    grid = _cdiv(B, bt)
    return bt, grid * bt, grid


@functools.partial(jax.jit, static_argnames=("batch_tile", "mxu_dtype"))
def made_forward_pallas(theta, x, params_fm, batch_tile=32768, mxu_dtype=jnp.float32):
    """Returns (u, log_likelihood). params_fm from prepare_feature_major_params()."""
    B, n_cond = theta.shape
    n_inputs = x.shape[1]
    W0x_fm, W0t_fm, b0_fm, layers_fm, Wh_fm, bh_fm = params_fm
    n_layers = 1 + len(layers_fm) // 2

    bt, B_pad, grid = _choose_batch_tile(B, batch_tile)

    # Feature-major inputs, zero-padded to a whole number of lane-dense tiles.
    # Under jit the transpose + pad fuse into a single copy per input; no concat.
    x_fm = jnp.pad(x.T, ((0, 0), (0, B_pad - B)))              # (n_inputs, B_pad)
    th_fm = jnp.pad(theta.T, ((0, 0), (0, B_pad - B)))         # (n_cond,  B_pad)

    full = lambda arr: pl.BlockSpec(arr.shape, lambda i: (0, 0))  # grid-invariant weights
    in_specs = [pl.BlockSpec((n_inputs, bt), lambda i: (0, i)),
                pl.BlockSpec((n_cond, bt), lambda i: (0, i)),
                full(W0x_fm), full(W0t_fm), full(b0_fm)]
    for arr in layers_fm:
        in_specs.append(full(arr))
    in_specs += [full(Wh_fm), full(bh_fm)]

    out_specs = [pl.BlockSpec((n_inputs, bt), lambda i: (0, i)),   # u, lane-dense
                 pl.BlockSpec((1, bt), lambda i: (0, i))]          # ll, lane-dense
    out_shape = [jax.ShapeDtypeStruct((n_inputs, B_pad), jnp.float32),
                 jax.ShapeDtypeStruct((1, B_pad), jnp.float32)]

    grid_spec = pltpu.PrefetchScalarGridSpec(
        num_scalar_prefetch=0,
        grid=(grid,),
        in_specs=in_specs,
        out_specs=out_specs,
    )

    u_fm, ll = pl.pallas_call(
        _made_kernel(n_inputs, n_layers, mxu_dtype),
        out_shape=out_shape,
        grid_spec=grid_spec,
        compiler_params=pltpu.CompilerParams(
            dimension_semantics=("parallel",),        # shards the batch grid across TCs (v7x)
            vmem_limit_bytes=32 * 1024 * 1024),       # explicit budget; <= physical on all gens
    )(x_fm, th_fm, W0x_fm, W0t_fm, b0_fm, *layers_fm, Wh_fm, bh_fm)

    # Slice padded columns off BEFORE transposing; both fuse under jit.
    u = u_fm[:, :B].T
    log_like = ll[0, :B]
    return u, log_like


# ----------------------------- Pure-JAX reference -----------------------------

def made_forward_ref(theta, x, masked_params, n_inputs):
    Wx, Ws_masked, bs, Wm_masked, bm, Wp_masked, bp = masked_params
    h = jax.nn.relu(theta @ Wx + x @ Ws_masked[0] + bs[0])
    for W, b in zip(Ws_masked[1:], bs[1:]):
        h = jax.nn.relu(h @ W + b)
    m = h @ Wm_masked + bm
    logp = h @ Wp_masked + bp
    u = jnp.exp(0.5 * logp) * (x - m)
    diff = jnp.sum(u ** 2 - logp, axis=1)
    constant = float(n_inputs * np.log(2.0 * np.pi))
    ll = -0.5 * (constant + diff)
    return u, ll


# ----------------------------- Main -----------------------------

if __name__ == "__main__":
    n_conditionals = 4
    n_inputs = 8
    n_hiddens = [32, 32]

    # Masks (static, sequential order / sequential mode as in the module defaults).
    degrees = create_degrees(n_inputs, n_hiddens, "sequential", "sequential")
    Ms, Mmp = create_masks(degrees)

    key = jax.random.PRNGKey(0)
    kp, kt, kx, kt2, kx2 = jax.random.split(key, 5)
    Wx, Ws, bs, Wm, bm, Wp, bp = create_params(kp, n_conditionals, n_inputs, n_hiddens)

    # Apply MADE masks to weights (elementwise, static -> done in glue).
    Ws_masked = [jnp.asarray(M) * W for M, W in zip(Ms, Ws)]
    Wm_masked = jnp.asarray(Mmp) * Wm
    Wp_masked = jnp.asarray(Mmp) * Wp
    masked_params = (Wx, Ws_masked, bs, Wm_masked, bm, Wp_masked, bp)
    params_fm = prepare_feature_major_params(masked_params)

    # --- Small-batch check (single lane-dense grid step) ---
    batch = 16
    theta = jax.random.normal(kt, (batch, n_conditionals), dtype=jnp.float32)
    x = jax.random.normal(kx, (batch, n_inputs), dtype=jnp.float32)

    u, ll = made_forward_pallas(theta, x, params_fm)
    u = jax.block_until_ready(u)
    ll = jax.block_until_ready(ll)

    u_ref, ll_ref = made_forward_ref(theta, x, masked_params, n_inputs)
    np.testing.assert_allclose(np.asarray(u), np.asarray(u_ref), rtol=1e-4, atol=1e-4)
    np.testing.assert_allclose(np.asarray(ll), np.asarray(ll_ref), rtol=1e-4, atol=1e-4)

    # --- Larger-batch check (>= 2 parallel grid steps + edge padding path) ---
    batch2 = 3000
    theta2 = jax.random.normal(kt2, (batch2, n_conditionals), dtype=jnp.float32)
    x2 = jax.random.normal(kx2, (batch2, n_inputs), dtype=jnp.float32)

    u2, ll2 = made_forward_pallas(theta2, x2, params_fm)
    u2 = jax.block_until_ready(u2)
    ll2 = jax.block_until_ready(ll2)

    u2_ref, ll2_ref = made_forward_ref(theta2, x2, masked_params, n_inputs)
    np.testing.assert_allclose(np.asarray(u2), np.asarray(u2_ref), rtol=1e-4, atol=1e-4)
    np.testing.assert_allclose(np.asarray(ll2), np.asarray(ll2_ref), rtol=1e-4, atol=1e-4)

    # TODO(synk): generate_samples() is a host-side autoregressive numpy loop; only
    # the forward pass (u, log_likelihood) is implemented as a kernel.
    print("KERNEL_OK")
</pallas_src>

<mosaic_0001>
module attributes {stable_mosaic.version = 11 : i64} {
  func.func @kernel(%arg0: i32, %arg1: memref<8x256xf32, #tpu.memory_space<vmem>>, %arg2: memref<4x256xf32, #tpu.memory_space<vmem>>, %arg3: memref<32x8xf32, #tpu.memory_space<vmem>>, %arg4: memref<32x4xf32, #tpu.memory_space<vmem>>, %arg5: memref<32x1xf32, #tpu.memory_space<vmem>>, %arg6: memref<32x32xf32, #tpu.memory_space<vmem>>, %arg7: memref<32x1xf32, #tpu.memory_space<vmem>>, %arg8: memref<16x32xf32, #tpu.memory_space<vmem>>, %arg9: memref<16x1xf32, #tpu.memory_space<vmem>>, %arg10: memref<8x256xf32, #tpu.memory_space<vmem>>, %arg11: memref<1x256xf32, #tpu.memory_space<vmem>>) attributes {dimension_semantics = [#tpu.dimension_semantics<parallel>], iteration_bounds = array<i64: 1>, scalar_prefetch = 0 : i64, scratch_operands = 0 : i64, tpu.core_type = #tpu.core_type<tc>, window_params = [{transform_indices = @transform_0, window_bounds = array<i64: 8, 256>}, {transform_indices = @transform_1, window_bounds = array<i64: 4, 256>}, {pipeline_mode = #tpu.pipeline_mode<synchronous>, transform_indices = @transform_2, window_bounds = array<i64: 32, 8>}, {pipeline_mode = #tpu.pipeline_mode<synchronous>, transform_indices = @transform_3, window_bounds = array<i64: 32, 4>}, {pipeline_mode = #tpu.pipeline_mode<synchronous>, transform_indices = @transform_4, window_bounds = array<i64: 32, 1>}, {pipeline_mode = #tpu.pipeline_mode<synchronous>, transform_indices = @transform_5, window_bounds = array<i64: 32, 32>}, {pipeline_mode = #tpu.pipeline_mode<synchronous>, transform_indices = @transform_6, window_bounds = array<i64: 32, 1>}, {pipeline_mode = #tpu.pipeline_mode<synchronous>, transform_indices = @transform_7, window_bounds = array<i64: 16, 32>}, {pipeline_mode = #tpu.pipeline_mode<synchronous>, transform_indices = @transform_8, window_bounds = array<i64: 16, 1>}, {transform_indices = @transform_9, window_bounds = array<i64: 8, 256>}, {transform_indices = @transform_10, window_bounds = array<i64: 1, 256>}]} {
    %c0 = arith.constant 0 : index
    %c0_0 = arith.constant 0 : index
    %0 = vector.load %arg1[%c0, %c0_0] : memref<8x256xf32, #tpu.memory_space<vmem>>, vector<8x256xf32>
    %c0_1 = arith.constant 0 : index
    %c0_2 = arith.constant 0 : index
    %1 = vector.load %arg3[%c0_1, %c0_2] : memref<32x8xf32, #tpu.memory_space<vmem>>, vector<32x8xf32>
    %cst = arith.constant dense<0.000000e+00> : vector<32x256xf32>
    %2 = tpu.matmul %1, %0, %cst {dimension_numbers = #tpu.dot_dimension_numbers<[1], [0], [0], [1], [0, 0, 1, 1], [], []>} : vector<32x8xf32>, vector<8x256xf32>, vector<32x256xf32> -> vector<32x256xf32>
    %c0_3 = arith.constant 0 : index
    %c0_4 = arith.constant 0 : index
    %3 = vector.load %arg4[%c0_3, %c0_4] : memref<32x4xf32, #tpu.memory_space<vmem>>, vector<32x4xf32>
    %c0_5 = arith.constant 0 : index
    %c0_6 = arith.constant 0 : index
    %4 = vector.load %arg2[%c0_5, %c0_6] : memref<4x256xf32, #tpu.memory_space<vmem>>, vector<4x256xf32>
    %cst_7 = arith.constant dense<0.000000e+00> : vector<32x256xf32>
    %5 = tpu.matmul %3, %4, %cst_7 {dimension_numbers = #tpu.dot_dimension_numbers<[1], [0], [0], [1], [0, 0, 1, 1], [], []>} : vector<32x4xf32>, vector<4x256xf32>, vector<32x256xf32> -> vector<32x256xf32>
    %6 = arith.addf %2, %5 : vector<32x256xf32>
    %c0_8 = arith.constant 0 : index
    %c0_9 = arith.constant 0 : index
    %7 = vector.load %arg5[%c0_8, %c0_9] : memref<32x1xf32, #tpu.memory_space<vmem>>, vector<32x1xf32>
    %8 = vector.broadcast %7 : vector<32x1xf32> to vector<32x256xf32>
    %9 = arith.addf %6, %8 : vector<32x256xf32>
    %cst_10 = arith.constant 0.000000e+00 : f32
    %10 = vector.broadcast %cst_10 : f32 to vector<32x256xf32>
    %11 = arith.maximumf %9, %10 : vector<32x256xf32>
    %c0_11 = arith.constant 0 : index
    %c0_12 = arith.constant 0 : index
    %12 = vector.load %arg6[%c0_11, %c0_12] : memref<32x32xf32, #tpu.memory_space<vmem>>, vector<32x32xf32>
    %c0_13 = arith.constant 0 : index
    %c0_14 = arith.constant 0 : index
    %13 = vector.load %arg7[%c0_13, %c0_14] : memref<32x1xf32, #tpu.memory_space<vmem>>, vector<32x1xf32>
    %cst_15 = arith.constant dense<0.000000e+00> : vector<32x256xf32>
    %14 = tpu.matmul %12, %11, %cst_15 {dimension_numbers = #tpu.dot_dimension_numbers<[1], [0], [0], [1], [0, 0, 1, 1], [], []>} : vector<32x32xf32>, vector<32x256xf32>, vector<32x256xf32> -> vector<32x256xf32>
    %15 = vector.broadcast %13 : vector<32x1xf32> to vector<32x256xf32>
    %16 = arith.addf %14, %15 : vector<32x256xf32>
    %cst_16 = arith.constant 0.000000e+00 : f32
    %17 = vector.broadcast %cst_16 : f32 to vector<32x256xf32>
    %18 = arith.maximumf %16, %17 : vector<32x256xf32>
    %c0_17 = arith.constant 0 : index
    %c0_18 = arith.constant 0 : index
    %19 = vector.load %arg8[%c0_17, %c0_18] : memref<16x32xf32, #tpu.memory_space<vmem>>, vector<16x32xf32>
    %cst_19 = arith.constant dense<0.000000e+00> : vector<16x256xf32>
    %20 = tpu.matmul %19, %18, %cst_19 {dimension_numbers = #tpu.dot_dimension_numbers<[1], [0], [0], [1], [0, 0, 1, 1], [], []>} : vector<16x32xf32>, vector<32x256xf32>, vector<16x256xf32> -> vector<16x256xf32>
    %c0_20 = arith.constant 0 : index
    %c0_21 = arith.constant 0 : index
    %21 = vector.load %arg9[%c0_20, %c0_21] : memref<16x1xf32, #tpu.memory_space<vmem>>, vector<16x1xf32>
    %22 = vector.broadcast %21 : vector<16x1xf32> to vector<16x256xf32>
    %23 = arith.addf %20, %22 : vector<16x256xf32>
    %24 = vector.extract_strided_slice %23 {offsets = [0, 0], sizes = [8, 256], strides = [1, 1]} : vector<16x256xf32> to vector<8x256xf32>
    %25 = vector.extract_strided_slice %23 {offsets = [8, 0], sizes = [8, 256], strides = [1, 1]} : vector<16x256xf32> to vector<8x256xf32>
    %cst_22 = arith.constant 5.000000e-01 : f32
    %26 = vector.broadcast %cst_22 : f32 to vector<8x256xf32>
    %27 = arith.mulf %26, %25 : vector<8x256xf32>
    %28 = math.exp %27 : vector<8x256xf32>
    %29 = arith.subf %0, %24 : vector<8x256xf32>
    %30 = arith.mulf %28, %29 : vector<8x256xf32>
    %c0_23 = arith.constant 0 : index
    %c0_24 = arith.constant 0 : index
    %31 = vector.load %arg10[%c0_23, %c0_24] : memref<8x256xf32, #tpu.memory_space<vmem>>, vector<8x256xf32>
    tpu.vector_store %arg10[%c0_23, %c0_24], %30 {strides = array<i32>} : memref<8x256xf32, #tpu.memory_space<vmem>>, vector<8x256xf32>,
    %32 = arith.mulf %30, %30 : vector<8x256xf32>
    %33 = arith.subf %32, %25 : vector<8x256xf32>
    %cst_25 = arith.constant dense<0.000000e+00> : vector<256xf32>
    %34 = vector.multi_reduction <add>, %33, %cst_25 [0] : vector<8x256xf32> to vector<256xf32>
    %35 = vector.shape_cast %34 : vector<256xf32> to vector<1x256xf32>
    %cst_26 = arith.constant 14.7030163 : f32
    %36 = vector.broadcast %cst_26 : f32 to vector<1x256xf32>
    %37 = arith.addf %36, %35 : vector<1x256xf32>
    %cst_27 = arith.constant -5.000000e-01 : f32
    %38 = vector.broadcast %cst_27 : f32 to vector<1x256xf32>
    %39 = arith.mulf %38, %37 : vector<1x256xf32>
    %c0_28 = arith.constant 0 : index
    %c0_29 = arith.constant 0 : index
    %40 = vector.load %arg11[%c0_28, %c0_29] : memref<1x256xf32, #tpu.memory_space<vmem>>, vector<1x256xf32>
    tpu.vector_store %arg11[%c0_28, %c0_29], %39 {strides = array<i32>} : memref<1x256xf32, #tpu.memory_space<vmem>>, vector<1x256xf32>,
    return
  }
  func.func @transform_0(%arg0: i32) -> (i32, i32) {
    %c0_i32 = arith.constant 0 : i32
    %c0_i32_0 = arith.constant 0 : i32
    return %c0_i32, %arg0 : i32, i32
  }
  func.func @transform_1(%arg0: i32) -> (i32, i32) {
    %c0_i32 = arith.constant 0 : i32
    %c0_i32_0 = arith.constant 0 : i32
    return %c0_i32, %arg0 : i32, i32
  }
  func.func @transform_2(%arg0: i32) -> (i32, i32) {
    %c0_i32 = arith.constant 0 : i32
    %c0_i32_0 = arith.constant 0 : i32
    %c0_i32_1 = arith.constant 0 : i32
    return %c0_i32, %c0_i32_0 : i32, i32
  }
  func.func @transform_3(%arg0: i32) -> (i32, i32) {
    %c0_i32 = arith.constant 0 : i32
    %c0_i32_0 = arith.constant 0 : i32
    %c0_i32_1 = arith.constant 0 : i32
    return %c0_i32, %c0_i32_0 : i32, i32
  }
  func.func @transform_4(%arg0: i32) -> (i32, i32) {
    %c0_i32 = arith.constant 0 : i32
    %c0_i32_0 = arith.constant 0 : i32
    %c0_i32_1 = arith.constant 0 : i32
    return %c0_i32, %c0_i32_0 : i32, i32
  }
  func.func @transform_5(%arg0: i32) -> (i32, i32) {
    %c0_i32 = arith.constant 0 : i32
    %c0_i32_0 = arith.constant 0 : i32
    %c0_i32_1 = arith.constant 0 : i32
    return %c0_i32, %c0_i32_0 : i32, i32
  }
  func.func @transform_6(%arg0: i32) -> (i32, i32) {
    %c0_i32 = arith.constant 0 : i32
    %c0_i32_0 = arith.constant 0 : i32
    %c0_i32_1 = arith.constant 0 : i32
    return %c0_i32, %c0_i32_0 : i32, i32
  }
  func.func @transform_7(%arg0: i32) -> (i32, i32) {
    %c0_i32 = arith.constant 0 : i32
    %c0_i32_0 = arith.constant 0 : i32
    %c0_i32_1 = arith.constant 0 : i32
    return %c0_i32, %c0_i32_0 : i32, i32
  }
  func.func @transform_8(%arg0: i32) -> (i32, i32) {
    %c0_i32 = arith.constant 0 : i32
    %c0_i32_0 = arith.constant 0 : i32
    %c0_i32_1 = arith.constant 0 : i32
    return %c0_i32, %c0_i32_0 : i32, i32
  }
  func.func @transform_9(%arg0: i32) -> (i32, i32) {
    %c0_i32 = arith.constant 0 : i32
    %c0_i32_0 = arith.constant 0 : i32
    return %c0_i32, %arg0 : i32, i32
  }
  func.func @transform_10(%arg0: i32) -> (i32, i32) {
    %c0_i32 = arith.constant 0 : i32
    %c0_i32_0 = arith.constant 0 : i32
    return %c0_i32, %arg0 : i32, i32
  }
}

</mosaic_0001>

<bundles_post_ra>
// kernel: made_forward_pallas.1
= control target key start
LH: loop header
LB: loop body
LE: loop exit
PB: predicated region body
PF: predicated region fallthrough
CT: control target
= control target key end

     0   :  { %vm60_vm0 = vcmask 1043456   ;;  %v644_v1 = vmov 0.0   ;;  %v645_v3 = vmov 0   ;;  %vm47_vm1 = vcmask 31744   ;;  %s824_s1 = inlined_call_operand.vmem [shape: f32[4,256], index: 1, kind: input, shape index: {}]   ;;  %s825_s3 = inlined_call_operand.vmem [shape: f32[32,4], index: 3, kind: input, shape index: {}]   ;;  %s826_s0 = inlined_call_operand.vmem [shape: f32[8,256], index: 0, kind: input, shape index: {}]   ;;  %s827_s4 = inlined_call_operand.vmem [shape: f32[32,1], index: 4, kind: input, shape index: {}]   ;;  %s828_s6 = inlined_call_operand.vmem [shape: f32[32,1], index: 6, kind: input, shape index: {}]   ;;  %s829_s8 = inlined_call_operand.vmem [shape: f32[16,1], index: 8, kind: input, shape index: {}]   ;;  %s830_s2 = inlined_call_operand.vmem [shape: f32[32,8], index: 2, kind: input, shape index: {}]   ;;  %s831_s5 = inlined_call_operand.vmem [shape: f32[32,32], index: 5, kind: input, shape index: {}]   ;;  %s832_s7 = inlined_call_operand.vmem [shape: f32[16,32], index: 7, kind: input, shape index: {}]   ;;  %s833_s9 = inlined_call_operand.vmem [shape: f32[8,256], index: 9, kind: output, shape index: {0}]   ;;  %s834_s10 = inlined_call_operand.vmem [shape: f32[1,256], index: 10, kind: output, shape index: {1}]  }
   0x1   :  { %v44_v0 = vld [vmem:[%s824_s1] sm:$0xff]  ;;  %129 = vmatprep.mubr.f32.mxu0 %v644_v1  ;;  %401 = vmatprep.mubr.f32.mxu1 %v644_v1  ;;  %v713_v5 = vld [vmem:[%s826_s0 + $0x8] sm:$0xff]  ;;  %v258_v8 = vld [vmem:[%s827_s4 + $0x10] sm:$0xff]  ;;  %vm154_vm2 = vcmask 64512   ;;  %vm324_vm3 = vcmask 261120  }
   0x2   :  { %v46_v2 = vcombine.high %v44_v0, %v44_v0  ;;  %637 = vset.pattern.permute.xlu0 %v645_v3  ;;  %638 = vset.pattern.permute.xlu1 %v645_v3  ;;  %v40_v4 = vld [vmem:[%s825_s3] sm:$0xff]  ;;  %v257_v9 = vld [vmem:[%s827_s4 + $0x8] sm:$0xff]  ;;  %v259_v11 = vld [vmem:[%s827_s4 + $0x18] sm:$0xff] }
   0x3   :  { %v718_v6 = vld [vmem:[%s826_s0] sm:$0xff]  ;;  %v41_v10 = vld [vmem:[%s825_s3 + $0x8] sm:$0xff]  ;;  %272 = vperm.xlu1 %638, %v258_v8   ;;  %v42_v13 = vld [vmem:[%s825_s3 + $0x10] sm:$0xff] }
   0x4   :  { %594 = vmatprep.subr.msk.mxu0 %vm60_vm0, %v46_v2  ;;  %v256_v7 = vld [vmem:[%s827_s4] sm:$0xff]  ;;  %v301_v14 = vld [vmem:[%s828_s6 + $0x8] sm:$0xff]  ;;  %v302_v15 = vld [vmem:[%s828_s6 + $0x10] sm:$0xff] }
   0x5   :  { %595 = vmatpush1.msk.msra.mxu0 %vm60_vm0, %v44_v0  ;;  %262 = vperm.xlu0 %637, %v256_v7   ;;  %v300_v12 = vld [vmem:[%s828_s6] sm:$0xff]  ;;  %v43_v16 = vld [vmem:[%s825_s3 + $0x18] sm:$0xff]  ;;  %v437_v18 = vld [vmem:[%s829_s8 + $0x8] sm:$0xff] }
   0x6   :  { %596 = vmatmul.mubr.msk.f32.vlgmr.msra.gmra.mrb[0].mxu0 %vm47_vm1, %v40_v4  ;;  %167 = vmatprep.subr.mxu0 %v713_v5  ;;  %v303_v17 = vld [vmem:[%s828_s6 + $0x18] sm:$0xff]  ;;  %v36_v19 = vld [vmem:[%s830_s2] sm:$0xff]  ;;  %v37_v21 = vld [vmem:[%s830_s2 + $0x8] sm:$0xff] }
   0x7   :  { %135 = vmatprep.mubr.f32.mxu0 %v644_v1  ;;  %168 = vmatpush1.msra.mxu0 %v718_v6  ;;  %v436_v20 = vld [vmem:[%s829_s8] sm:$0xff]  ;;  %v38_v22 = vld [vmem:[%s830_s2 + $0x10] sm:$0xff]  ;;  %v39_v23 = vld [vmem:[%s830_s2 + $0x18] sm:$0xff] }
   0x8   :  { %277 = vperm.xlu1 %638, %v259_v11   ;;  %v296_v56 = vld [vmem:[%s831_s5] sm:$0xff]  ;;  %v297_v57 = vld [vmem:[%s831_s5 + $0x8] sm:$0xff]  ;;  %v298_v58 = vld [vmem:[%s831_s5 + $0x10] sm:$0xff] }
   0x9   :  { %267 = vperm.xlu0 %637, %v257_v9   ;;  %v299_v59 = vld [vmem:[%s831_s5 + $0x18] sm:$0xff] }
   0xa   :  { %597 = vmatmul.mubr.msk.f32.gmra.mrb[2].mxu0 %vm47_vm1, %v41_v10 }
   0xb   :  { %141 = vmatprep.mubr.f32.mxu0 %v644_v1 }
   0xc   :  { %311 = vperm.xlu1 %638, %v301_v14  }
   0xd   :  { %306 = vperm.xlu0 %637, %v300_v12  }
   0xe   :  { %598 = vmatmul.mubr.msk.f32.gmra.mrb[4].mxu0 %vm47_vm1, %v42_v13 }
   0xf   :  { %147 = vmatprep.mubr.f32.mxu0 %v644_v1 }
  0x10   :  { %321 = vperm.xlu1 %638, %v303_v17  }
  0x11   :  { %316 = vperm.xlu0 %637, %v302_v15  }
  0x12   :  { %599 = vmatmul.mubr.msk.f32.gmra.mrb[6].mxu0 %vm47_vm1, %v43_v16 }
  0x13   :  { %231 = vmatprep.mubr.f32.mxu0 %v644_v1 }
  0x14   :  { %440 = vperm.xlu1 %638, %v436_v20  }
  0x15   :  { %445 = vperm.xlu0 %637, %v437_v18  }
  0x16   :  { %600 = vmatmul.mubr.msk.f32.vlgmr.msra.gmra.mrb[0].mxu0 %vm154_vm2, %v36_v19 }
  0x17   :  { %237 = vmatprep.mubr.f32.mxu0 %v644_v1 }
  0x1a   :  { %601 = vmatmul.mubr.msk.f32.gmra.mrb[2].mxu0 %vm154_vm2, %v37_v21 }
  0x1b   :  { %243 = vmatprep.mubr.f32.mxu0 %v644_v1 }
  0x1e   :  { %602 = vmatmul.mubr.msk.f32.gmra.mrb[4].mxu0 %vm154_vm2, %v38_v22 }
  0x1f   :  { %249 = vmatprep.mubr.f32.mxu0 %v644_v1 }
  0x22   :  { %603 = vmatmul.mubr.msk.f32.gmra.mrb[6].mxu0 %vm154_vm2, %v39_v23 }
  0x82   :  { %v273_v33 = vpop.permute.xlu1 %272 }
  0x84   :  { %v263_v24 = vpop.permute.xlu0 %262 }
  0x87   :  { %v278_v44 = vpop.permute.xlu1 %277 }
  0x88   :  { %v268_v28 = vpop.permute.xlu0 %267 }
  0x8b   :  { %v312_v0 = vpop.permute.xlu1 %311 }
  0x8c   :  { %v307_v62 = vpop.permute.xlu0 %306 }
  0x8f   :  { %v322_v19 = vpop.permute.xlu1 %321 }
  0x90   :  { %v317_v16 = vpop.permute.xlu0 %316 }
  0xe9   :  { %v233_v25 = vpop.f32.mrb[0].mxu0 }
  0xea   :  { %v235_v26 = vpop.f32.mrb[1].mxu0  ;;  %v280_v27 = vadd.f32 %v263_v24, %v233_v25 }
  0xeb   :  { %v281_v29 = vadd.f32 %v263_v24, %v235_v26 }
  0xec   :  { %v288_v35 = vmax.f32 %v280_v27, 0.0 }
  0xed   :  { %v239_v30 = vpop.f32.mrb[2].mxu0  ;;  %v289_v37 = vmax.f32 %v281_v29, 0.0 }
  0xee   :  { %v282_v31 = vadd.f32 %v268_v28, %v239_v30  ;;  %v241_v32 = vpop.f32.mrb[3].mxu0 }
  0xef   :  { %v283_v34 = vadd.f32 %v268_v28, %v241_v32  ;;  %v435_v32 = vld [vmem:[%s832_s7 + $0x8] sm:$0xff] }
  0xf0   :  { %v290_v36 = vmax.f32 %v282_v31, 0.0  ;;  %v434_v31 = vld [vmem:[%s832_s7] sm:$0xff] }
  0xf1   :  { %v291_v38 = vmax.f32 %v283_v34, 0.0  ;;  %v245_v39 = vpop.f32.mrb[4].mxu0 }
  0xf2   :  { %v247_v40 = vpop.f32.mrb[5].mxu0  ;;  %v612_v41 = vpack.c.bf16 %v290_v36, %v288_v35  ;;  %v284_v43 = vadd.f32 %v273_v33, %v245_v39  ;;  %v446_v35 = vpop.permute.xlu0 %445 }
  0xf3   :  { %v610_v42 = vpack.c.bf16 %v291_v38, %v289_v37  ;;  %v285_v45 = vadd.f32 %v273_v33, %v247_v40 }
  0xf4   :  { %v292_v50 = vmax.f32 %v284_v43, 0.0 }
  0xf5   :  { %v251_v46 = vpop.f32.mrb[6].mxu0  ;;  %611 = vmatprep.subr.bf16.mxu1 %v610_v42  ;;  %v293_v52 = vmax.f32 %v285_v45, 0.0 }
  0xf6   :  { %v286_v47 = vadd.f32 %v278_v44, %v251_v46  ;;  %v253_v48 = vpop.f32.mrb[7].mxu0  ;;  %613 = vmatpush1.bf16.msra.mxu1 %v612_v41 }
  0xf7   :  { %v287_v49 = vadd.f32 %v278_v44, %v253_v48 }
  0xf8   :  { %v294_v51 = vmax.f32 %v286_v47, 0.0 }
  0xf9   :  { %v295_v53 = vmax.f32 %v287_v49, 0.0 }
  0xfa   :  { %v616_v54 = vpack.c.bf16 %v294_v51, %v292_v50 }
  0xfb   :  { %v614_v55 = vpack.c.bf16 %v295_v53, %v293_v52 }
  0xfd   :  { %615 = vmatprep.subr.bf16.mxu1 %v614_v55 }
  0xfe   :  { %617 = vmatpush1.bf16.msra.mxu1 %v616_v54 }
 0x101   :  { %604 = vmatmul.mubr.msk.f32.vlgmr.msra.gmra.mrb[0].mxu1 %vm324_vm3, %v296_v56 }
 0x102   :  { %407 = vmatprep.mubr.f32.mxu1 %v644_v1 }
 0x105   :  { %605 = vmatmul.mubr.msk.f32.gmra.mrb[2].mxu1 %vm324_vm3, %v297_v57 }
 0x106   :  { %413 = vmatprep.mubr.f32.mxu1 %v644_v1 }
 0x109   :  { %606 = vmatmul.mubr.msk.f32.gmra.mrb[4].mxu1 %vm324_vm3, %v298_v58 }
 0x10a   :  { %419 = vmatprep.mubr.f32.mxu1 %v644_v1 }
 0x10d   :  { %607 = vmatmul.mubr.msk.f32.gmra.mrb[6].mxu1 %vm324_vm3, %v299_v59 }
 0x10e   :  { %518 = vmatprep.mubr.f32.mxu1 %v644_v1 }
 0x1d4   :  { %v403_v60 = vpop.f32.mrb[0].mxu1 }
 0x1d5   :  { %v405_v61 = vpop.f32.mrb[1].mxu1  ;;  %v404_v63 = vadd.f32 %v403_v60, %v307_v62 }
 0x1d6   :  { %v406_v2 = vadd.f32 %v405_v61, %v307_v62  ;;  %v646_v62 = vmov 1966171168  }
 0x1d7   :  { %v426_v9 = vmax.f32 %v404_v63, 0.0  ;;  %v567_v63 = vunpack.c.l.s4 %v646_v62 }
 0x1d8   :  { %v409_v3 = vpop.f32.mrb[2].mxu1  ;;  %v427_v11 = vmax.f32 %v406_v2, 0.0 }
 0x1d9   :  { %v410_v4 = vadd.f32 %v409_v3, %v312_v0  ;;  %v411_v7 = vpop.f32.mrb[3].mxu1 }
 0x1da   :  { %v412_v8 = vadd.f32 %v411_v7, %v312_v0  ;;  %v569_v0 = vlaneseq }
 0x1db   :  { %v428_v10 = vmax.f32 %v410_v4, 0.0 }
 0x1dc   :  { %v429_v12 = vmax.f32 %v412_v8, 0.0  ;;  %v415_v13 = vpop.f32.mrb[4].mxu1  ;;  %v568_v8 = vunpack.c.0.s8 %v567_v63  ;;  %vm583_vm4 = vcmp.lt.s32.totalorder %v569_v0, 256 }
 0x1dd   :  { %v620_v14 = vpack.c.bf16 %v428_v10, %v426_v9  ;;  %v417_v15 = vpop.f32.mrb[5].mxu1  ;;  %v416_v18 = vadd.f32 %v415_v13, %v317_v16  ;;  %v570_v9 = vshrl.u32 %v569_v0, 7 }
 0x1de   :  { %v618_v17 = vpack.c.bf16 %v429_v12, %v427_v11  ;;  %v418_v20 = vadd.f32 %v417_v15, %v317_v16 }
 0x1df   :  { %v430_v25 = vmax.f32 %v416_v18, 0.0 }
 0x1e0   :  { %v421_v21 = vpop.f32.mrb[6].mxu1  ;;  %619 = vmatprep.subr.bf16.mxu1 %v618_v17  ;;  %v431_v27 = vmax.f32 %v418_v20, 0.0 }
 0x1e1   :  { %v422_v22 = vadd.f32 %v421_v21, %v322_v19  ;;  %v423_v23 = vpop.f32.mrb[7].mxu1  ;;  %621 = vmatpush1.bf16.msra.mxu1 %v620_v14  ;;  %v571_v14 = vsub.s32 %v568_v8, %v570_v9 }
 0x1e2   :  { %v424_v24 = vadd.f32 %v423_v23, %v322_v19 }
 0x1e3   :  { %v432_v26 = vmax.f32 %v422_v22, 0.0 }
 0x1e4   :  { %v433_v28 = vmax.f32 %v424_v24, 0.0 }
 0x1e5   :  { %v624_v29 = vpack.c.bf16 %v432_v26, %v430_v25 }
 0x1e6   :  { %v622_v30 = vpack.c.bf16 %v433_v28, %v431_v27 }
 0x1e8   :  { %623 = vmatprep.subr.bf16.mxu1 %v622_v30 }
 0x1e9   :  { %625 = vmatpush1.bf16.msra.mxu1 %v624_v29 }
 0x1ec   :  { %608 = vmatmul.mubr.msk.f32.vlgmr.msra.gmra.mrb[8].mxu1 %vm324_vm3, %v434_v31 }
 0x1ed   :  { %524 = vmatprep.mubr.f32.mxu1 %v644_v1  ;;  %v441_v1 = vpop.permute.xlu1 %440 }
 0x1f0   :  { %609 = vmatmul.mubr.msk.f32.gmra.mrb[10].mxu1 %vm324_vm3, %v435_v32 }
 0x2bf   :  { %v520_v33 = vpop.f32.mrb[8].mxu1 }
 0x2c0   :  { %v522_v34 = vpop.f32.mrb[9].mxu1  ;;  %v521_v44 = vadd.f32 %v520_v33, %v441_v1 }
 0x2c1   :  { %v523_v45 = vadd.f32 %v522_v34, %v441_v1 }
 0x2c2   :  { %v537_v46 = vsub.f32 %v718_v6, %v521_v44 }
 0x2c3   :  { %v526_v36 = vpop.f32.mrb[10].mxu1  ;;  %v538_v48 = vsub.f32 %v713_v5, %v523_v45 }
 0x2c4   :  { %v527_v37 = vadd.f32 %v526_v36, %v446_v35  ;;  %v528_v38 = vpop.f32.mrb[11].mxu1 }
 0x2c5   :  { %v529_v39 = vadd.f32 %v528_v38, %v446_v35 }
 0x2c6   :  { %v531_v40 = vmul.f32 0.5, %v527_v37 }
 0x2c7   :  { %v532_v41 = vmul.f32 0.5, %v529_v39 }
 0x2c8   :  { %v533_v42 = vmul.f32 1.442695, %v531_v40 }
 0x2c9   :  { %v535_v43 = vmul.f32 1.442695, %v532_v41 }
 0x2ca   :  { %640 = vpow2.f32 %v533_v42 }
 0x2cb   :  { %642 = vpow2.f32 %v535_v43 }
 0x2d4   :  { %v641_v47 = vpop.eup %640 }
 0x2d5   :  { %v643_v49 = vpop.eup %642  ;;  %v539_v50 = vmul.f32 %v641_v47, %v537_v46 }
 0x2d6   :  { %v540_v51 = vmul.f32 %v643_v49, %v538_v48 }
 0x2d7   :  { %541 = vst [vmem:[%s833_s9] sm:$0xff] %v539_v50  ;;  %v543_v52 = vmul.f32 %v539_v50, %v539_v50 }
 0x2d8   :  { %542 = vst [vmem:[%s833_s9 + $0x8] sm:$0xff] %v540_v51  ;;  %v544_v53 = vmul.f32 %v540_v51, %v540_v51 }
 0x2d9   :  { %v545_v54 = vsub.f32 %v543_v52, %v527_v37 }
 0x2da   :  { %v546_v55 = vsub.f32 %v544_v53, %v529_v39 }
 0x2db   :  { %v547_v56 = vrot.slane %v545_v54, 4 }
 0x2dc   :  { %v553_v6 = vrot.slane %v546_v55, 4 }
 0x2dd   :  { %v548_v57 = vadd.f32 %v547_v56, %v545_v54 }
 0x2de   :  { %v554_v58 = vadd.f32 %v553_v6, %v546_v55 }
 0x2df   :  { %v549_v5 = vrot.slane %v548_v57, 2 }
 0x2e0   :  { %v555_v59 = vrot.slane %v554_v58, 2 }
 0x2e1   :  { %v550_v60 = vadd.f32 %v549_v5, %v548_v57 }
 0x2e2   :  { %v556_v61 = vadd.f32 %v555_v59, %v554_v58 }
 0x2e3   :  { %v551_v2 = vrot.slane %v550_v60, 1 }
 0x2e4   :  { %v557_v3 = vrot.slane %v556_v61, 1 }
 0x2e5   :  { %v552_v4 = vadd.f32 %v551_v2, %v550_v60 }
 0x2e6   :  { %v558_v7 = vadd.f32 %v557_v3, %v556_v61 }
 0x2e7   :  { %v559_v10 = vadd.f32 14.703016, %v552_v4 }
 0x2e8   :  { %v560_v11 = vadd.f32 14.703016, %v558_v7 }
 0x2e9   :  { %v561_v12 = vmul.f32 -0.5, %v559_v10 }
 0x2ea   :  { %v562_v13 = vmul.f32 -0.5, %v560_v11 }
 0x2ec   :  { %v565_v15 = vcombine.low %v561_v12, %v562_v13 }
 0x2ee   :  { %v572_v16 = vrot.slane %v565_v15, %v571_v14 }
 0x2f0   :  { %v579_v17 = vrot.slane %v572_v16, %v571_v14 }
 0x2f2   :  { %585 = vst.msk [vmem:[%s834_s10] sm:$0x3] %vm583_vm4, %v579_v17 }

</bundles_post_ra>
